<compile_context>
chip_gen: v5e
topology: v5e:2x2
jax: 0.10.0
libtpu: 0.0.40
codegen_flags: <defaults>
</compile_context>

<pallas_src>
import functools

import jax
import jax.numpy as jnp
from jax import lax
from jax.experimental import pallas as pl
from jax.experimental.pallas import tpu as pltpu


def _round_up(n, m):
    return (n + m - 1) // m * m


def _vmem_limit_bytes():
    # Generation-aware VMEM budget: ~75% of physical per-core VMEM
    # (v5e/v6e: ~96 MiB, v7x: ~48 MiB) instead of a hard-coded 64 MiB.
    try:
        cap = int(pltpu.get_tpu_info().vmem_capacity_bytes)
    except Exception:  # conservative fallback if the query is unavailable
        cap = 64 * 1024 * 1024
    return cap * 3 // 4


def _repconvn_kernel(x_ref, w_ref, b_ref, o_ref, s_ref, *, W, L, cin, cin_p):
    """Fused (3x3 'same' conv + bias + SiLU) for one batch image.

    x_ref: [Cin, L]         input activation (f32 or bf16), flattened H*W pixels
    w_ref: [Cout, 9*cin_p]  bf16 folded equivalent kernel, tap-major layout
    b_ref: [Cout, 1]        f32  folded equivalent bias
    o_ref: [Cout, L]        bf16 output, flattened H*W pixels (no junk columns)
    s_ref: [9*cin_p, L]     bf16 im2col scratch slab
    """
    # Output-pixel column index; used to zero the contributions that the
    # 'same' padding zeroes at the left/right image borders.
    col = lax.broadcasted_iota(jnp.int32, (1, L), 1) % W

    # Build the im2col slab: rows [tap*cin_p, tap*cin_p+cin) hold the input
    # shifted by (dy-1, dx-1), with zeros wherever the 3x3 'same' conv pads.
    # This absorbs the unaligned-lane realignment of the 8 shifted taps into
    # one staging copy and enables a single long-K matmul below.
    for dy in range(3):
        for dx in range(3):
            tap = dy * 3 + dx
            r0 = tap * cin_p
            s = (dy - 1) * W + (dx - 1)      # flat source offset of this tap
            dst_lo = max(0, -s)              # first output pixel fed from x
            src_lo = max(0, s)
            n = L - abs(s)
            v = x_ref[:, src_lo:src_lo + n].astype(jnp.bfloat16)
            if dx == 0:      # source column w-1 -> invalid at w == 0
                v = jnp.where(col[:, dst_lo:dst_lo + n] != 0, v, jnp.zeros_like(v))
            elif dx == 2:    # source column w+1 -> invalid at w == W-1
                v = jnp.where(col[:, dst_lo:dst_lo + n] != W - 1, v, jnp.zeros_like(v))
            s_ref[r0:r0 + cin, dst_lo:dst_lo + n] = v
            # Top/bottom 'same' padding: output pixels whose source row lies
            # outside the image get an all-zero slab entry.
            if s > 0:
                s_ref[r0:r0 + cin, L - s:L] = jnp.zeros((cin, s), s_ref.dtype)
            elif s < 0:
                s_ref[r0:r0 + cin, 0:-s] = jnp.zeros((cin, -s), s_ref.dtype)
            # Channel-padding rows: their weights are zero, but uninitialised
            # VMEM could hold NaNs and NaN*0 would poison the matmul.
            if cin_p > cin:
                s_ref[r0 + cin:r0 + cin_p, :] = jnp.zeros((cin_p - cin, L), s_ref.dtype)

    # One fused MXU matmul with K = 9*cin_p (instead of 9 short-K matmuls),
    # f32 accumulation.
    y = jnp.dot(w_ref[...], s_ref[...], preferred_element_type=jnp.float32)
    y = y + b_ref[...]                        # folded conv/BN bias
    y = y * jax.nn.sigmoid(y)                 # SiLU (sigmoid -> EUP slot)
    o_ref[...] = y.astype(o_ref.dtype)        # bf16 store, lane-dense


def fold_repconvn_params(params, cin_p, eps=1e-5):
    """Fold conv3x3+BN1 and conv1x1+BN2 (inference-mode BN) into one equivalent
    3x3 kernel + bias -- mirrors RepConvN.get_equivalent_kernel_bias() -- and
    lay the kernel out as [Cout, 9*cin_p] matching the kernel's im2col slab."""
    (k3, g1, be1, m1, v1, k1, g2, be2, m2, v2) = params
    s1 = g1 / jnp.sqrt(v1 + eps)                          # [Cout]
    s2 = g2 / jnp.sqrt(v2 + eps)                          # [Cout]
    k3_eq = k3 * s1[:, None, None, None]                  # [Cout, Cin, 3, 3]
    b3_eq = be1 - m1 * s1
    k1_eq = k1 * s2[:, None, None, None]                  # [Cout, Cin, 1, 1]
    b1_eq = be2 - m2 * s2
    # pad the 1x1 kernel into the 3x3 centre and sum the branches
    k_eq = k3_eq.at[:, :, 1, 1].add(k1_eq[:, :, 0, 0])
    b_eq = b3_eq + b1_eq
    cout, cin = k_eq.shape[0], k_eq.shape[1]
    # [Cout, Cin, 3, 3] -> [Cout, 3, 3, Cin] -> channel-pad -> [Cout, 9*cin_p]
    w = jnp.transpose(k_eq, (0, 2, 3, 1))
    w = jnp.pad(w, ((0, 0), (0, 0), (0, 0), (0, cin_p - cin)))
    return w.reshape(cout, 9 * cin_p), b_eq


def repconvn_pallas(x_nchw, params, *, eps=1e-5, out_dtype=jnp.bfloat16):
    """x_nchw: [B, Cin, H, W] float32 (or bfloat16). Returns [B, Cout, H, W]
    in `out_dtype` (bf16 by default -- the HBM-bound-friendly choice)."""
    B, Cin, H, W = x_nchw.shape
    L = H * W
    # channel padding of the im2col slab so every tap block starts at a
    # packing-friendly sublane offset (weights of padded rows are zero)
    cin_p = _round_up(Cin, 8)

    w2d, b_eq = fold_repconvn_params(params, cin_p, eps)
    Cout = w2d.shape[0]
    w2d = w2d.astype(jnp.bfloat16)
    bias = b_eq.reshape(Cout, 1).astype(jnp.float32)

    # NCHW -> channel-major flattened pixels: a FREE metadata reshape (the
    # per-image [Cin, H*W] slab is already contiguous). No padding, no cast,
    # no extra HBM pass -- the kernel does the bf16 cast and 'same' padding.
    x_flat = x_nchw.reshape(B, Cin, L)

    kernel = functools.partial(_repconvn_kernel, W=W, L=L, cin=Cin, cin_p=cin_p)

    out = pl.pallas_call(
        kernel,
        out_shape=jax.ShapeDtypeStruct((B, Cout, L), out_dtype),
        grid_spec=pltpu.PrefetchScalarGridSpec(
            num_scalar_prefetch=0,
            grid=(B,),
            in_specs=[
                # whole flattened image of one batch element per grid step
                pl.BlockSpec((None, Cin, L), lambda b: (b, 0, 0)),
                # grid-invariant folded weights / bias (constant index map ->
                # DMA'd once and kept resident in VMEM across grid steps)
                pl.BlockSpec((Cout, 9 * cin_p), lambda b: (0, 0)),
                pl.BlockSpec((Cout, 1), lambda b: (0, 0)),
            ],
            out_specs=pl.BlockSpec((None, Cout, L), lambda b: (b, 0, 0)),
            scratch_shapes=[pltpu.VMEM((9 * cin_p, L), jnp.bfloat16)],
        ),
        compiler_params=pltpu.CompilerParams(
            dimension_semantics=("parallel",),
            vmem_limit_bytes=_vmem_limit_bytes(),
        ),
    )(x_flat, w2d, bias)

    # The kernel's pixel axis is exactly H*W -> this reshape is free (no
    # de-pad slice / extra HBM pass).
    return out.reshape(B, Cout, H, W)


def init_params(key, c1, c2):
    """Deterministic, non-trivial weights + eval-mode BN stats."""
    ks = jax.random.split(key, 6)
    k3 = 0.2 * jax.random.normal(ks[0], (c2, c1, 3, 3), jnp.float32)   # conv1 (3x3, no bias)
    k1 = 0.2 * jax.random.normal(ks[1], (c2, c1, 1, 1), jnp.float32)   # conv2 (1x1, no bias)
    g1 = 1.0 + 0.1 * jax.random.normal(ks[2], (c2,), jnp.float32)      # BN1
    be1 = 0.1 * jax.random.normal(ks[3], (c2,), jnp.float32)
    m1 = 0.05 * jnp.arange(c2, dtype=jnp.float32)
    v1 = 1.0 + 0.1 * jnp.arange(c2, dtype=jnp.float32)
    g2 = 1.0 + 0.1 * jax.random.normal(ks[4], (c2,), jnp.float32)      # BN2
    be2 = 0.1 * jax.random.normal(ks[5], (c2,), jnp.float32)
    m2 = 0.03 * jnp.arange(c2, dtype=jnp.float32)
    v2 = 1.0 + 0.2 * jnp.arange(c2, dtype=jnp.float32)
    return (k3, g1, be1, m1, v1, k1, g2, be2, m2, v2)


def repconvn_reference(x, params, eps=1e-5):
    """Pure-JAX f32 reference of RepConvN.forward (eval-mode BN, bn=None)."""
    (k3, g1, be1, m1, v1, k1, g2, be2, m2, v2) = params
    dn = ("NCHW", "OIHW", "NCHW")

    def bn(y, g, be, m, v):
        sh = (1, -1, 1, 1)
        return (y - m.reshape(sh)) / jnp.sqrt(v.reshape(sh) + eps) * g.reshape(sh) + be.reshape(sh)

    y1 = lax.conv_general_dilated(x, k3, (1, 1), ((1, 1), (1, 1)), dimension_numbers=dn)
    y1 = bn(y1, g1, be1, m1, v1)
    y2 = lax.conv_general_dilated(x, k1, (1, 1), ((0, 0), (0, 0)), dimension_numbers=dn)
    y2 = bn(y2, g2, be2, m2, v2)
    y = y1 + y2
    return y * jax.nn.sigmoid(y)                                       # SiLU


if __name__ == "__main__":
    B, C1, H, W = 2, 4, 16, 16
    C2 = 8

    key = jax.random.PRNGKey(0)
    kx, kp = jax.random.split(key)
    x = jax.random.normal(kx, (B, C1, H, W), jnp.float32)
    params = init_params(kp, C1, C2)

    out = repconvn_pallas(x, params)
    out = jax.block_until_ready(out)

    ref = repconvn_reference(x, params)
    assert out.shape == (B, C2, H, W)
    assert out.dtype == jnp.bfloat16
    err = float(jnp.max(jnp.abs(out.astype(jnp.float32) - ref)))
    # bf16 matmul operands + bf16 output vs. an all-f32 reference -> relaxed tol.
    assert jnp.allclose(out.astype(jnp.float32), ref, atol=6e-2, rtol=6e-2), err

    print("KERNEL_OK")
</pallas_src>

<mosaic_0001>
module attributes {stable_mosaic.version = 11 : i64} {
  func.func @_repconvn_kernel(%arg0: i32, %arg1: memref<1x4x256xf32, #tpu.memory_space<vmem>>, %arg2: memref<8x72xbf16, #tpu.memory_space<vmem>>, %arg3: memref<8x1xf32, #tpu.memory_space<vmem>>, %arg4: memref<1x8x256xbf16, #tpu.memory_space<vmem>>, %arg5: memref<72x256xbf16, #tpu.memory_space<vmem>>) attributes {dimension_semantics = [#tpu.dimension_semantics<parallel>], iteration_bounds = array<i64: 2>, scalar_prefetch = 0 : i64, scratch_operands = 1 : i64, tpu.core_type = #tpu.core_type<tc>, window_params = [{transform_indices = @transform_0, window_bounds = array<i64: 1, 4, 256>}, {pipeline_mode = #tpu.pipeline_mode<synchronous>, transform_indices = @transform_1, window_bounds = array<i64: 8, 72>}, {pipeline_mode = #tpu.pipeline_mode<synchronous>, transform_indices = @transform_2, window_bounds = array<i64: 8, 1>}, {transform_indices = @transform_3, window_bounds = array<i64: 1, 8, 256>}]} {
    %0 = tpu.iota {dimensions = array<i32: 1>} : vector<1x256xi32>
    %c16_i32 = arith.constant 16 : i32
    %c0_i32 = arith.constant 0 : i32
    %1 = arith.cmpi eq, %c16_i32, %c0_i32 : i32
    %c1_i32 = arith.constant 1 : i32
    %2 = arith.select %1, %c1_i32, %c16_i32 : i32
    %3 = vector.broadcast %2 : i32 to vector<1x256xi32>
    %4 = arith.remsi %0, %3 : vector<1x256xi32>
    %c0_i32_0 = arith.constant 0 : i32
    %5 = vector.broadcast %c0_i32_0 : i32 to vector<1x256xi32>
    %6 = arith.cmpi ne, %4, %5 : vector<1x256xi32>
    %c0_i32_1 = arith.constant 0 : i32
    %7 = vector.broadcast %c0_i32_1 : i32 to vector<1x256xi32>
    %8 = arith.cmpi slt, %4, %7 : vector<1x256xi32>
    %c0_i32_2 = arith.constant 0 : i32
    %9 = arith.cmpi slt, %2, %c0_i32_2 : i32
    %10 = vector.broadcast %9 : i1 to vector<1x256xi1>
    %11 = vector.broadcast %10 : vector<1x256xi1> to vector<1x256xi1>
    %12 = arith.xori %8, %11 : vector<1x256xi1>
    %13 = arith.andi %12, %6 : vector<1x256xi1>
    %14 = vector.broadcast %2 : i32 to vector<1x256xi32>
    %15 = arith.addi %4, %14 : vector<1x256xi32>
    %16 = arith.select %13, %15, %4 : vector<1x256xi1>, vector<1x256xi32>
    %c0 = arith.constant 0 : index
    %c0_3 = arith.constant 0 : index
    %c0_4 = arith.constant 0 : index
    %17 = vector.load %arg1[%c0, %c0_3, %c0_4] : memref<1x4x256xf32, #tpu.memory_space<vmem>>, vector<1x4x239xf32>
    %18 = vector.shape_cast %17 : vector<1x4x239xf32> to vector<4x239xf32>
    %19 = arith.truncf %18 : vector<4x239xf32> to vector<4x239xbf16>
    %20 = vector.extract_strided_slice %16 {offsets = [0, 17], sizes = [1, 239], strides = [1, 1]} : vector<1x256xi32> to vector<1x239xi32>
    %c0_i32_5 = arith.constant 0 : i32
    %21 = vector.broadcast %c0_i32_5 : i32 to vector<1x239xi32>
    %22 = arith.cmpi ne, %20, %21 : vector<1x239xi32>
    %cst = arith.constant 0.000000e+00 : bf16
    %23 = vector.broadcast %cst : bf16 to vector<4x239xbf16>
    %24 = vector.shape_cast %22 : vector<1x239xi1> to vector<1x239xi1>
    %25 = vector.broadcast %24 : vector<1x239xi1> to vector<4x239xi1>
    %26 = arith.select %25, %19, %23 : vector<4x239xi1>, vector<4x239xbf16>
    %c0_6 = arith.constant 0 : index
    %c17 = arith.constant 17 : index
    %27 = vector.load %arg5[%c0_6, %c17] : memref<72x256xbf16, #tpu.memory_space<vmem>>, vector<4x239xbf16>
    tpu.vector_store %arg5[%c0_6, %c17], %26 {strides = array<i32>} : memref<72x256xbf16, #tpu.memory_space<vmem>>, vector<4x239xbf16>,
    %cst_7 = arith.constant 0.000000e+00 : bf16
    %28 = vector.broadcast %cst_7 : bf16 to vector<4x17xbf16>
    %c0_8 = arith.constant 0 : index
    %c0_9 = arith.constant 0 : index
    %29 = vector.load %arg5[%c0_8, %c0_9] : memref<72x256xbf16, #tpu.memory_space<vmem>>, vector<4x17xbf16>
    tpu.vector_store %arg5[%c0_8, %c0_9], %28 {strides = array<i32>} : memref<72x256xbf16, #tpu.memory_space<vmem>>, vector<4x17xbf16>,
    %cst_10 = arith.constant 0.000000e+00 : bf16
    %30 = vector.broadcast %cst_10 : bf16 to vector<4x256xbf16>
    %c4 = arith.constant 4 : index
    %c0_11 = arith.constant 0 : index
    %31 = vector.load %arg5[%c4, %c0_11] : memref<72x256xbf16, #tpu.memory_space<vmem>>, vector<4x256xbf16>
    tpu.vector_store %arg5[%c4, %c0_11], %30 {strides = array<i32>} : memref<72x256xbf16, #tpu.memory_space<vmem>>, vector<4x256xbf16>,
    %c0_12 = arith.constant 0 : index
    %c0_13 = arith.constant 0 : index
    %c0_14 = arith.constant 0 : index
    %32 = vector.load %arg1[%c0_12, %c0_13, %c0_14] : memref<1x4x256xf32, #tpu.memory_space<vmem>>, vector<1x4x240xf32>
    %33 = vector.shape_cast %32 : vector<1x4x240xf32> to vector<4x240xf32>
    %34 = arith.truncf %33 : vector<4x240xf32> to vector<4x240xbf16>
    %c8 = arith.constant 8 : index
    %c16 = arith.constant 16 : index
    %35 = vector.load %arg5[%c8, %c16] : memref<72x256xbf16, #tpu.memory_space<vmem>>, vector<4x240xbf16>
    tpu.vector_store %arg5[%c8, %c16], %34 {strides = array<i32>} : memref<72x256xbf16, #tpu.memory_space<vmem>>, vector<4x240xbf16>,
    %cst_15 = arith.constant 0.000000e+00 : bf16
    %36 = vector.broadcast %cst_15 : bf16 to vector<4x16xbf16>
    %c8_16 = arith.constant 8 : index
    %c0_17 = arith.constant 0 : index
    %37 = vector.load %arg5[%c8_16, %c0_17] : memref<72x256xbf16, #tpu.memory_space<vmem>>, vector<4x16xbf16>
    tpu.vector_store %arg5[%c8_16, %c0_17], %36 {strides = array<i32>} : memref<72x256xbf16, #tpu.memory_space<vmem>>, vector<4x16xbf16>,
    %cst_18 = arith.constant 0.000000e+00 : bf16
    %38 = vector.broadcast %cst_18 : bf16 to vector<4x256xbf16>
    %c12 = arith.constant 12 : index
    %c0_19 = arith.constant 0 : index
    %39 = vector.load %arg5[%c12, %c0_19] : memref<72x256xbf16, #tpu.memory_space<vmem>>, vector<4x256xbf16>
    tpu.vector_store %arg5[%c12, %c0_19], %38 {strides = array<i32>} : memref<72x256xbf16, #tpu.memory_space<vmem>>, vector<4x256xbf16>,
    %c0_20 = arith.constant 0 : index
    %c0_21 = arith.constant 0 : index
    %c0_22 = arith.constant 0 : index
    %40 = vector.load %arg1[%c0_20, %c0_21, %c0_22] : memref<1x4x256xf32, #tpu.memory_space<vmem>>, vector<1x4x241xf32>
    %41 = vector.shape_cast %40 : vector<1x4x241xf32> to vector<4x241xf32>
    %42 = arith.truncf %41 : vector<4x241xf32> to vector<4x241xbf16>
    %43 = vector.extract_strided_slice %16 {offsets = [0, 15], sizes = [1, 241], strides = [1, 1]} : vector<1x256xi32> to vector<1x241xi32>
    %c15_i32 = arith.constant 15 : i32
    %44 = vector.broadcast %c15_i32 : i32 to vector<1x241xi32>
    %45 = arith.cmpi ne, %43, %44 : vector<1x241xi32>
    %cst_23 = arith.constant 0.000000e+00 : bf16
    %46 = vector.broadcast %cst_23 : bf16 to vector<4x241xbf16>
    %47 = vector.shape_cast %45 : vector<1x241xi1> to vector<1x241xi1>
    %48 = vector.broadcast %47 : vector<1x241xi1> to vector<4x241xi1>
    %49 = arith.select %48, %42, %46 : vector<4x241xi1>, vector<4x241xbf16>
    %c16_24 = arith.constant 16 : index
    %c15 = arith.constant 15 : index
    %50 = vector.load %arg5[%c16_24, %c15] : memref<72x256xbf16, #tpu.memory_space<vmem>>, vector<4x241xbf16>
    tpu.vector_store %arg5[%c16_24, %c15], %49 {strides = array<i32>} : memref<72x256xbf16, #tpu.memory_space<vmem>>, vector<4x241xbf16>,
    %cst_25 = arith.constant 0.000000e+00 : bf16
    %51 = vector.broadcast %cst_25 : bf16 to vector<4x15xbf16>
    %c16_26 = arith.constant 16 : index
    %c0_27 = arith.constant 0 : index
    %52 = vector.load %arg5[%c16_26, %c0_27] : memref<72x256xbf16, #tpu.memory_space<vmem>>, vector<4x15xbf16>
    tpu.vector_store %arg5[%c16_26, %c0_27], %51 {strides = array<i32>} : memref<72x256xbf16, #tpu.memory_space<vmem>>, vector<4x15xbf16>,
    %cst_28 = arith.constant 0.000000e+00 : bf16
    %53 = vector.broadcast %cst_28 : bf16 to vector<4x256xbf16>
    %c20 = arith.constant 20 : index
    %c0_29 = arith.constant 0 : index
    %54 = vector.load %arg5[%c20, %c0_29] : memref<72x256xbf16, #tpu.memory_space<vmem>>, vector<4x256xbf16>
    tpu.vector_store %arg5[%c20, %c0_29], %53 {strides = array<i32>} : memref<72x256xbf16, #tpu.memory_space<vmem>>, vector<4x256xbf16>,
    %c0_30 = arith.constant 0 : index
    %c0_31 = arith.constant 0 : index
    %c0_32 = arith.constant 0 : index
    %55 = vector.load %arg1[%c0_30, %c0_31, %c0_32] : memref<1x4x256xf32, #tpu.memory_space<vmem>>, vector<1x4x255xf32>
    %56 = vector.shape_cast %55 : vector<1x4x255xf32> to vector<4x255xf32>
    %57 = arith.truncf %56 : vector<4x255xf32> to vector<4x255xbf16>
    %58 = vector.extract_strided_slice %16 {offsets = [0, 1], sizes = [1, 255], strides = [1, 1]} : vector<1x256xi32> to vector<1x255xi32>
    %c0_i32_33 = arith.constant 0 : i32
    %59 = vector.broadcast %c0_i32_33 : i32 to vector<1x255xi32>
    %60 = arith.cmpi ne, %58, %59 : vector<1x255xi32>
    %cst_34 = arith.constant 0.000000e+00 : bf16
    %61 = vector.broadcast %cst_34 : bf16 to vector<4x255xbf16>
    %62 = vector.shape_cast %60 : vector<1x255xi1> to vector<1x255xi1>
    %63 = vector.broadcast %62 : vector<1x255xi1> to vector<4x255xi1>
    %64 = arith.select %63, %57, %61 : vector<4x255xi1>, vector<4x255xbf16>
    %c24 = arith.constant 24 : index
    %c1 = arith.constant 1 : index
    %65 = vector.load %arg5[%c24, %c1] : memref<72x256xbf16, #tpu.memory_space<vmem>>, vector<4x255xbf16>
    tpu.vector_store %arg5[%c24, %c1], %64 {strides = array<i32>} : memref<72x256xbf16, #tpu.memory_space<vmem>>, vector<4x255xbf16>,
    %cst_35 = arith.constant 0.000000e+00 : bf16
    %66 = vector.broadcast %cst_35 : bf16 to vector<4x1xbf16>
    %c24_36 = arith.constant 24 : index
    %c0_37 = arith.constant 0 : index
    %67 = vector.load %arg5[%c24_36, %c0_37] : memref<72x256xbf16, #tpu.memory_space<vmem>>, vector<4x1xbf16>
    tpu.vector_store %arg5[%c24_36, %c0_37], %66 {strides = array<i32>} : memref<72x256xbf16, #tpu.memory_space<vmem>>, vector<4x1xbf16>,
    %cst_38 = arith.constant 0.000000e+00 : bf16
    %68 = vector.broadcast %cst_38 : bf16 to vector<4x256xbf16>
    %c28 = arith.constant 28 : index
    %c0_39 = arith.constant 0 : index
    %69 = vector.load %arg5[%c28, %c0_39] : memref<72x256xbf16, #tpu.memory_space<vmem>>, vector<4x256xbf16>
    tpu.vector_store %arg5[%c28, %c0_39], %68 {strides = array<i32>} : memref<72x256xbf16, #tpu.memory_space<vmem>>, vector<4x256xbf16>,
    %c0_40 = arith.constant 0 : index
    %c0_41 = arith.constant 0 : index
    %c0_42 = arith.constant 0 : index
    %70 = vector.load %arg1[%c0_40, %c0_41, %c0_42] : memref<1x4x256xf32, #tpu.memory_space<vmem>>, vector<1x4x256xf32>
    %71 = vector.shape_cast %70 : vector<1x4x256xf32> to vector<4x256xf32>
    %72 = arith.truncf %71 : vector<4x256xf32> to vector<4x256xbf16>
    %c32 = arith.constant 32 : index
    %c0_43 = arith.constant 0 : index
    %73 = vector.load %arg5[%c32, %c0_43] : memref<72x256xbf16, #tpu.memory_space<vmem>>, vector<4x256xbf16>
    tpu.vector_store %arg5[%c32, %c0_43], %72 {strides = array<i32>} : memref<72x256xbf16, #tpu.memory_space<vmem>>, vector<4x256xbf16>,
    %cst_44 = arith.constant 0.000000e+00 : bf16
    %74 = vector.broadcast %cst_44 : bf16 to vector<4x256xbf16>
    %c36 = arith.constant 36 : index
    %c0_45 = arith.constant 0 : index
    %75 = vector.load %arg5[%c36, %c0_45] : memref<72x256xbf16, #tpu.memory_space<vmem>>, vector<4x256xbf16>
    tpu.vector_store %arg5[%c36, %c0_45], %74 {strides = array<i32>} : memref<72x256xbf16, #tpu.memory_space<vmem>>, vector<4x256xbf16>,
    %c0_46 = arith.constant 0 : index
    %c0_47 = arith.constant 0 : index
    %c1_48 = arith.constant 1 : index
    %76 = vector.load %arg1[%c0_46, %c0_47, %c1_48] : memref<1x4x256xf32, #tpu.memory_space<vmem>>, vector<1x4x255xf32>
    %77 = vector.shape_cast %76 : vector<1x4x255xf32> to vector<4x255xf32>
    %78 = arith.truncf %77 : vector<4x255xf32> to vector<4x255xbf16>
    %79 = vector.extract_strided_slice %16 {offsets = [0, 0], sizes = [1, 255], strides = [1, 1]} : vector<1x256xi32> to vector<1x255xi32>
    %c15_i32_49 = arith.constant 15 : i32
    %80 = vector.broadcast %c15_i32_49 : i32 to vector<1x255xi32>
    %81 = arith.cmpi ne, %79, %80 : vector<1x255xi32>
    %cst_50 = arith.constant 0.000000e+00 : bf16
    %82 = vector.broadcast %cst_50 : bf16 to vector<4x255xbf16>
    %83 = vector.shape_cast %81 : vector<1x255xi1> to vector<1x255xi1>
    %84 = vector.broadcast %83 : vector<1x255xi1> to vector<4x255xi1>
    %85 = arith.select %84, %78, %82 : vector<4x255xi1>, vector<4x255xbf16>
    %c40 = arith.constant 40 : index
    %c0_51 = arith.constant 0 : index
    %86 = vector.load %arg5[%c40, %c0_51] : memref<72x256xbf16, #tpu.memory_space<vmem>>, vector<4x255xbf16>
    tpu.vector_store %arg5[%c40, %c0_51], %85 {strides = array<i32>} : memref<72x256xbf16, #tpu.memory_space<vmem>>, vector<4x255xbf16>,
    %cst_52 = arith.constant 0.000000e+00 : bf16
    %87 = vector.broadcast %cst_52 : bf16 to vector<4x1xbf16>
    %c40_53 = arith.constant 40 : index
    %c255 = arith.constant 255 : index
    %88 = vector.load %arg5[%c40_53, %c255] : memref<72x256xbf16, #tpu.memory_space<vmem>>, vector<4x1xbf16>
    tpu.vector_store %arg5[%c40_53, %c255], %87 {strides = array<i32>} : memref<72x256xbf16, #tpu.memory_space<vmem>>, vector<4x1xbf16>,
    %cst_54 = arith.constant 0.000000e+00 : bf16
    %89 = vector.broadcast %cst_54 : bf16 to vector<4x256xbf16>
    %c44 = arith.constant 44 : index
    %c0_55 = arith.constant 0 : index
    %90 = vector.load %arg5[%c44, %c0_55] : memref<72x256xbf16, #tpu.memory_space<vmem>>, vector<4x256xbf16>
    tpu.vector_store %arg5[%c44, %c0_55], %89 {strides = array<i32>} : memref<72x256xbf16, #tpu.memory_space<vmem>>, vector<4x256xbf16>,
    %c0_56 = arith.constant 0 : index
    %c0_57 = arith.constant 0 : index
    %c15_58 = arith.constant 15 : index
    %91 = vector.load %arg1[%c0_56, %c0_57, %c15_58] : memref<1x4x256xf32, #tpu.memory_space<vmem>>, vector<1x4x241xf32>
    %92 = vector.shape_cast %91 : vector<1x4x241xf32> to vector<4x241xf32>
    %93 = arith.truncf %92 : vector<4x241xf32> to vector<4x241xbf16>
    %94 = vector.extract_strided_slice %16 {offsets = [0, 0], sizes = [1, 241], strides = [1, 1]} : vector<1x256xi32> to vector<1x241xi32>
    %c0_i32_59 = arith.constant 0 : i32
    %95 = vector.broadcast %c0_i32_59 : i32 to vector<1x241xi32>
    %96 = arith.cmpi ne, %94, %95 : vector<1x241xi32>
    %cst_60 = arith.constant 0.000000e+00 : bf16
    %97 = vector.broadcast %cst_60 : bf16 to vector<4x241xbf16>
    %98 = vector.shape_cast %96 : vector<1x241xi1> to vector<1x241xi1>
    %99 = vector.broadcast %98 : vector<1x241xi1> to vector<4x241xi1>
    %100 = arith.select %99, %93, %97 : vector<4x241xi1>, vector<4x241xbf16>
    %c48 = arith.constant 48 : index
    %c0_61 = arith.constant 0 : index
    %101 = vector.load %arg5[%c48, %c0_61] : memref<72x256xbf16, #tpu.memory_space<vmem>>, vector<4x241xbf16>
    tpu.vector_store %arg5[%c48, %c0_61], %100 {strides = array<i32>} : memref<72x256xbf16, #tpu.memory_space<vmem>>, vector<4x241xbf16>,
    %cst_62 = arith.constant 0.000000e+00 : bf16
    %102 = vector.broadcast %cst_62 : bf16 to vector<4x15xbf16>
    %c48_63 = arith.constant 48 : index
    %c241 = arith.constant 241 : index
    %103 = vector.load %arg5[%c48_63, %c241] : memref<72x256xbf16, #tpu.memory_space<vmem>>, vector<4x15xbf16>
    tpu.vector_store %arg5[%c48_63, %c241], %102 {strides = array<i32>} : memref<72x256xbf16, #tpu.memory_space<vmem>>, vector<4x15xbf16>,
    %cst_64 = arith.constant 0.000000e+00 : bf16
    %104 = vector.broadcast %cst_64 : bf16 to vector<4x256xbf16>
    %c52 = arith.constant 52 : index
    %c0_65 = arith.constant 0 : index
    %105 = vector.load %arg5[%c52, %c0_65] : memref<72x256xbf16, #tpu.memory_space<vmem>>, vector<4x256xbf16>
    tpu.vector_store %arg5[%c52, %c0_65], %104 {strides = array<i32>} : memref<72x256xbf16, #tpu.memory_space<vmem>>, vector<4x256xbf16>,
    %c0_66 = arith.constant 0 : index
    %c0_67 = arith.constant 0 : index
    %c16_68 = arith.constant 16 : index
    %106 = vector.load %arg1[%c0_66, %c0_67, %c16_68] : memref<1x4x256xf32, #tpu.memory_space<vmem>>, vector<1x4x240xf32>
    %107 = vector.shape_cast %106 : vector<1x4x240xf32> to vector<4x240xf32>
    %108 = arith.truncf %107 : vector<4x240xf32> to vector<4x240xbf16>
    %c56 = arith.constant 56 : index
    %c0_69 = arith.constant 0 : index
    %109 = vector.load %arg5[%c56, %c0_69] : memref<72x256xbf16, #tpu.memory_space<vmem>>, vector<4x240xbf16>
    tpu.vector_store %arg5[%c56, %c0_69], %108 {strides = array<i32>} : memref<72x256xbf16, #tpu.memory_space<vmem>>, vector<4x240xbf16>,
    %cst_70 = arith.constant 0.000000e+00 : bf16
    %110 = vector.broadcast %cst_70 : bf16 to vector<4x16xbf16>
    %c56_71 = arith.constant 56 : index
    %c240 = arith.constant 240 : index
    %111 = vector.load %arg5[%c56_71, %c240] : memref<72x256xbf16, #tpu.memory_space<vmem>>, vector<4x16xbf16>
    tpu.vector_store %arg5[%c56_71, %c240], %110 {strides = array<i32>} : memref<72x256xbf16, #tpu.memory_space<vmem>>, vector<4x16xbf16>,
    %cst_72 = arith.constant 0.000000e+00 : bf16
    %112 = vector.broadcast %cst_72 : bf16 to vector<4x256xbf16>
    %c60 = arith.constant 60 : index
    %c0_73 = arith.constant 0 : index
    %113 = vector.load %arg5[%c60, %c0_73] : memref<72x256xbf16, #tpu.memory_space<vmem>>, vector<4x256xbf16>
    tpu.vector_store %arg5[%c60, %c0_73], %112 {strides = array<i32>} : memref<72x256xbf16, #tpu.memory_space<vmem>>, vector<4x256xbf16>,
    %c0_74 = arith.constant 0 : index
    %c0_75 = arith.constant 0 : index
    %c17_76 = arith.constant 17 : index
    %114 = vector.load %arg1[%c0_74, %c0_75, %c17_76] : memref<1x4x256xf32, #tpu.memory_space<vmem>>, vector<1x4x239xf32>
    %115 = vector.shape_cast %114 : vector<1x4x239xf32> to vector<4x239xf32>
    %116 = arith.truncf %115 : vector<4x239xf32> to vector<4x239xbf16>
    %117 = vector.extract_strided_slice %16 {offsets = [0, 0], sizes = [1, 239], strides = [1, 1]} : vector<1x256xi32> to vector<1x239xi32>
    %c15_i32_77 = arith.constant 15 : i32
    %118 = vector.broadcast %c15_i32_77 : i32 to vector<1x239xi32>
    %119 = arith.cmpi ne, %117, %118 : vector<1x239xi32>
    %cst_78 = arith.constant 0.000000e+00 : bf16
    %120 = vector.broadcast %cst_78 : bf16 to vector<4x239xbf16>
    %121 = vector.shape_cast %119 : vector<1x239xi1> to vector<1x239xi1>
    %122 = vector.broadcast %121 : vector<1x239xi1> to vector<4x239xi1>
    %123 = arith.select %122, %116, %120 : vector<4x239xi1>, vector<4x239xbf16>
    %c64 = arith.constant 64 : index
    %c0_79 = arith.constant 0 : index
    %124 = vector.load %arg5[%c64, %c0_79] : memref<72x256xbf16, #tpu.memory_space<vmem>>, vector<4x239xbf16>
    tpu.vector_store %arg5[%c64, %c0_79], %123 {strides = array<i32>} : memref<72x256xbf16, #tpu.memory_space<vmem>>, vector<4x239xbf16>,
    %cst_80 = arith.constant 0.000000e+00 : bf16
    %125 = vector.broadcast %cst_80 : bf16 to vector<4x17xbf16>
    %c64_81 = arith.constant 64 : index
    %c239 = arith.constant 239 : index
    %126 = vector.load %arg5[%c64_81, %c239] : memref<72x256xbf16, #tpu.memory_space<vmem>>, vector<4x17xbf16>
    tpu.vector_store %arg5[%c64_81, %c239], %125 {strides = array<i32>} : memref<72x256xbf16, #tpu.memory_space<vmem>>, vector<4x17xbf16>,
    %cst_82 = arith.constant 0.000000e+00 : bf16
    %127 = vector.broadcast %cst_82 : bf16 to vector<4x256xbf16>
    %c68 = arith.constant 68 : index
    %c0_83 = arith.constant 0 : index
    %128 = vector.load %arg5[%c68, %c0_83] : memref<72x256xbf16, #tpu.memory_space<vmem>>, vector<4x256xbf16>
    tpu.vector_store %arg5[%c68, %c0_83], %127 {strides = array<i32>} : memref<72x256xbf16, #tpu.memory_space<vmem>>, vector<4x256xbf16>,
    %c0_84 = arith.constant 0 : index
    %c0_85 = arith.constant 0 : index
    %129 = vector.load %arg2[%c0_84, %c0_85] : memref<8x72xbf16, #tpu.memory_space<vmem>>, vector<8x72xbf16>
    %c0_86 = arith.constant 0 : index
    %c0_87 = arith.constant 0 : index
    %130 = vector.load %arg5[%c0_86, %c0_87] : memref<72x256xbf16, #tpu.memory_space<vmem>>, vector<72x256xbf16>
    %cst_88 = arith.constant dense<0.000000e+00> : vector<8x256xf32>
    %131 = tpu.matmul %129, %130, %cst_88 {dimension_numbers = #tpu.dot_dimension_numbers<[1], [0], [0], [1], [0, 0, 1, 1], [], []>} : vector<8x72xbf16>, vector<72x256xbf16>, vector<8x256xf32> -> vector<8x256xf32>
    %c0_89 = arith.constant 0 : index
    %c0_90 = arith.constant 0 : index
    %132 = vector.load %arg3[%c0_89, %c0_90] : memref<8x1xf32, #tpu.memory_space<vmem>>, vector<8x1xf32>
    %133 = vector.broadcast %132 : vector<8x1xf32> to vector<8x256xf32>
    %134 = arith.addf %131, %133 : vector<8x256xf32>
    %135 = arith.negf %134 : vector<8x256xf32>
    %136 = math.exp %135 : vector<8x256xf32>
    %cst_91 = arith.constant 1.000000e+00 : f32
    %137 = vector.broadcast %cst_91 : f32 to vector<8x256xf32>
    %138 = arith.addf %137, %136 : vector<8x256xf32>
    %139 = arith.divf %137, %138 : vector<8x256xf32>
    %140 = arith.mulf %134, %139 : vector<8x256xf32>
    %141 = arith.truncf %140 : vector<8x256xf32> to vector<8x256xbf16>
    %c0_92 = arith.constant 0 : index
    %c0_93 = arith.constant 0 : index
    %c0_94 = arith.constant 0 : index
    %142 = vector.load %arg4[%c0_92, %c0_93, %c0_94] : memref<1x8x256xbf16, #tpu.memory_space<vmem>>, vector<1x8x256xbf16>
    %143 = vector.shape_cast %142 : vector<1x8x256xbf16> to vector<8x256xbf16>
    %144 = vector.shape_cast %141 : vector<8x256xbf16> to vector<1x8x256xbf16>
    tpu.vector_store %arg4[%c0_92, %c0_93, %c0_94], %144 {strides = array<i32>} : memref<1x8x256xbf16, #tpu.memory_space<vmem>>, vector<1x8x256xbf16>,
    return
  }
  func.func @transform_0(%arg0: i32) -> (i32, i32, i32) {
    %c0_i32 = arith.constant 0 : i32
    %c0_i32_0 = arith.constant 0 : i32
    %c0_i32_1 = arith.constant 0 : i32
    return %arg0, %c0_i32, %c0_i32_0 : i32, i32, i32
  }
  func.func @transform_1(%arg0: i32) -> (i32, i32) {
    %c0_i32 = arith.constant 0 : i32
    %c0_i32_0 = arith.constant 0 : i32
    %c0_i32_1 = arith.constant 0 : i32
    return %c0_i32, %c0_i32_0 : i32, i32
  }
  func.func @transform_2(%arg0: i32) -> (i32, i32) {
    %c0_i32 = arith.constant 0 : i32
    %c0_i32_0 = arith.constant 0 : i32
    %c0_i32_1 = arith.constant 0 : i32
    return %c0_i32, %c0_i32_0 : i32, i32
  }
  func.func @transform_3(%arg0: i32) -> (i32, i32, i32) {
    %c0_i32 = arith.constant 0 : i32
    %c0_i32_0 = arith.constant 0 : i32
    %c0_i32_1 = arith.constant 0 : i32
    return %arg0, %c0_i32, %c0_i32_0 : i32, i32, i32
  }
}

</mosaic_0001>

<bundles_post_ra>
// kernel: tpu_custom_call.1
= control target key start
LH: loop header
LB: loop body
LE: loop exit
PB: predicated region body
PF: predicated region fallthrough
CT: control target
= control target key end

     0   :  { %8 = vsyncpa [#allocation4], 0  ;;  %s1212_s0 = inlined_call_operand.hbm [shape: f32[2,4,256], index: 0, kind: input, shape index: {}]   ;;  %s1213_s1 = inlined_call_operand.vmem [shape: bf16[8,72], index: 1, kind: input, shape index: {}]   ;;  %s1214_s2 = inlined_call_operand.vmem [shape: f32[8,1], index: 2, kind: input, shape index: {}]   ;;  %s1215_s3 = inlined_call_operand.hbm [shape: bf16[2,8,256], index: 3, kind: output, shape index: {}]  }
   0x1   :  { %10 = vsyncpa [#allocation4 + $0x1], 0 }
   0x2   :  { %11 = vsyncpa [#allocation5], 0 }
   0x3   :  { %13 = vsyncpa [#allocation5 + $0x1], 0  ;;  %s966_s12 = smov 0   ;;  %s968_s13 = smov 0  }
   0x4   :  { %s970_s14 = smov 0   ;;  %s972_s15 = smov 0  }
   0x5 LB: > { %s987_s16 = sadd.s32 4294967295, %s935_s15   ;;  %s714_s17 = sadd.s32 4294967294, %s935_s15   ;;  %s935_s15 = sphi %s972_s15, %s1231_s15   ;;  %s931_s14 = sphi %s970_s14, %s1230_s14   ;;  %s927_s13 = sphi %s968_s13, %s1229_s13   ;;  %s923_s12 = sphi %s966_s12, %s1228_s12  }
   0x6   : > { %s991_s18 = sadd.s32 1, %s935_s15   ;;  %s26_s19 = sadd.s32 1, %s931_s14 }
   0x7   : > { %s23_s20 = ssub.s32 %s935_s15, %s991_s18  ;;  %p33_p0 = scmp.ne.s32.totalorder %s931_s14, %s927_s13 }
   0x8   : > { %p24_p1 = scmp.eq.s32.totalorder %s23_s20, 0  ;;  %p34_p2 = scmp.eq.s32.totalorder %s935_s15, 0 }
   0x9   : > { %p39_p3 = scmp.ne.s32.totalorder %s927_s13, %s923_s12  ;;  %p40_p4 = scmp.eq.s32.totalorder %s987_s16, 0 }
   0xa   : > { %s1003_s21 = scalar_select %p24_p1, %s931_s14, %s26_s19  }
   0xb   : > { %p1005_p5 = por %p34_p2, %p33_p0  ;;  %p1009_p6 = por %p40_p4, %p39_p3 }
   0xc   : > { %p105_p7 = scmp.eq.s32.totalorder %s987_s16, 1  ;;  %p111_p8 = scmp.eq.s32.totalorder %s714_s17, 1 }
   0xd   : > { %p786_p10 = scmp.lt.s32.totalorder %s935_s15, 2  ;;  %s137_s26 = sand.u32 1, %s931_s14  }
   0xe   : > { %p1016_p11 = por %p105_p7, %p33_p0  ;;  %p1020_p12 = por %p111_p8, %p39_p3 }
   0xf   : > { %s764_s27 = sshll.u32 %s935_s15, 3  ;;  %s717_s28 = sshll.u32 %s137_s26, 3 }
  0x10   : > { %s146_s4 = scalar_lea.hbm %s1212_s0, %s764_s27  ;;  %s141_s6 = scalar_lea.vmem [#allocation3], %s717_s28 }
  0x11   : > { %s148_s5 = sshll.u32 %s146_s4, 4  ;;  %s150_s7 = sshll.u32 %s141_s6, 4  ;;  %s149_s5 = int_to_ptr.hbm [resolvable:$true] %s148_s5  ;;  %s151_s7 = int_to_ptr.vmem [resolvable:$true] %s150_s7 }
  0x12   : > { %p1031_p13 = pnand %p786_p10, %p1005_p5  ;;  %p720_p0 = scmp.ge.s32.totalorder %s935_s15, 1 }
  0x13   : > { %p155_p1 = scmp.lt.s32.totalorder %s935_s15, 3  ;;  %s138_s9 = scalar_lea.sflag [#allocation4], %s137_s26 }
  0x14   : > { %s839_s10 = sshra.s32 %s149_s5, 4  ;;  %p843_p3 = pneg %p1031_p13  ;;  %s840_s10 = int_to_ptr.hbm [resolvable:$true] %s839_s10 }
  0x15   : > { %s841_s11 = scalar_lea.hbm %s840_s10, 8  ;;  %s846_s20 = scalar_lea.hbm %s1212_s0, 16 }
  0x16   : > { %p842_p2 = scmp.ne.s32.totalorder %s840_s10, %s841_s11  ;;  %p847_p5 = scmp.lt.s32.totalorder %s840_s10, %s1212_s0 }
  0x17   : > { %p848_p8 = scmp.lt.s32.totalorder %s846_s20, %s841_s11 }
  0x18   : > { %p844_p4 = pnand %p843_p3, %p842_p2 }
  0x19   : > { %p849_p10 = por %p848_p8, %p847_p5 }
  0x1a   : > { %p845_p7 = pneg %p844_p4 }
  0x1c   : > { %p850_p9 = pnand %p849_p10, %p845_p7 }
  0x1e   : > { %853 = shalt.err (!%p850_p9)
}
  0x1f   : > { %781 = dma.hbm_to_vmem [thread:$0]  (!%p1031_p13), %s149_s5, 128, %s151_s7, %s138_s9  }
  0x20   : > { %p156_p2 = pnand %p720_p0, %p155_p1 }
  0x21   : > { %s1052_s26 = sand.u32 (!%p156_p2), 1, %s927_s13  }
  0x22   : > { %159 = sbr.rel (%p156_p2) target bundleno = 492 (0x1ec), region = 32  ;;  %s721_s28 = sshll.u32 (!%p156_p2), %s1052_s26, 3 }
  0x23   : > { %s162_s29 = scalar_lea.sflag (!%p156_p2), [#allocation4], %s1052_s26  ;;  %s1058_s30 = scalar_lea.vmem (!%p156_p2), [#allocation3], %s721_s28 }
  0x27   : > { %v192_v0 = vlaneseq }
  0x28   : > { %914 = dma.done.wait (%p1009_p6), %s162_s29, 128  }
  0x29   : > { %916 = vsyncadd (%p1009_p6), %s162_s29, 4294967168  ;;  %v937_v1 = vmov 0   ;;  %v193_v2 = vand.u32 127, %v192_v0  ;;  %s938_s23 = smov 17   ;;  %s939_s4 = smov 1   ;;  %v219_v8 = vld [vmem:[%s1058_s30] sm:$0xff] }
  0x2a   : > { %261 = vst [vmem:[#allocation2] sm:$0xcc] %v937_v1  ;;  %829 = vset.pattern.permute.xlu2 %v937_v1  ;;  %830 = vset.pattern.permute.xlu0 %v937_v1  ;;  %s940_s5 = smov 127   ;;  %s941_s6 = smov 15   ;;  %vm336_vm6 = vcmask 1039360   ;;  %v242_v30 = vunpack.c.l.b16 %v937_v1  ;;  %v243_v31 = vunpack.c.h.b16 %v937_v1  ;;  %vm1216_vm10 = vcmask 138240  }
  0x2b   : > { %282 = vst [vmem:[#allocation2 + $0x8] sm:$0xcc] %v937_v1  ;;  %v194_v3 = vadd.s32 128, %v193_v2  ;;  %v199_v4 = vand.u32 15, %v193_v2  ;;  %s942_s7 = smov 113   ;;  %s943_s8 = smov 111  }
  0x2c   : > { %324 = vst [vmem:[#allocation2 + $0x10] sm:$0xcc] %v937_v1  ;;  %s944_s9 = smov 112   ;;  %vm350_vm11 = vcmask 7168   ;;  %vm238_vm12 = vcmask 908288   ;;  %s945_s10 = smov 16  }
  0x2d   : > { %358 = vst [vmem:[#allocation2 + $0x18] sm:$0xcc] %v937_v1  ;;  %v206_v5 = vand.u32 15, %v194_v3  ;;  %vm291_vm0 = vcmp.ne.s32.totalorder %v199_v4, 15  ;;  %vm227_vm1 = vcmp.ne.s32.totalorder %v199_v4, 0  ;;  %s773_s22 = sshll.u32 %s987_s16, 3 }
  0x2e   : > { %368 = vst [vmem:[#allocation2 + $0x20] sm:$0xcc] %v937_v1  ;;  %s639_s30 = scalar_lea.hbm %s1215_s3, %s773_s22  ;;  %s188_s16 = scalar_lea.vmem [#allocation6], %s721_s28 }
  0x2f   : > { %401 = vst [vmem:[#allocation2 + $0x28] sm:$0xcc] %v937_v1  ;;  %vm292_vm2 = vcmp.ne.s32.totalorder %v206_v5, 15  ;;  %vm228_vm3 = vcmp.ne.s32.totalorder %v206_v5, 0 }
  0x30   : > { %433 = vst [vmem:[#allocation2 + $0x30] sm:$0xcc] %v937_v1  ;;  %vm297_vm4 = vmpackc.low %vm292_vm2, %vm291_vm0  ;;  %vm316_vm0 = vcmask 121856  }
  0x31   : > { %454 = vst [vmem:[#allocation2 + $0x38] sm:$0xcc] %v937_v1  ;;  %v298_v6 = vsel %vm297_vm4, 65537, %v937_v1  ;;  %vm233_vm5 = vmpackc.low %vm228_vm3, %vm227_vm1  ;;  %vm302_vm1 = vcmask 924672  }
  0x32   : > { %486 = vst [vmem:[#allocation2 + $0x40] sm:$0xcc] %v937_v1  ;;  %463 = vrot.lane.b32.xlu0 %v298_v6, %s938_s23  ;;  %377 = vrot.lane.b32.xlu1 %v298_v6, %s939_s4  ;;  %v234_v7 = vsel %vm233_vm5, 65537, %v937_v1 }
  0x33   : > { %333 = vrot.lane.b32.xlu2 %v234_v7, %s940_s5  ;;  %221 = vst [vmem:[#allocation1] ss:$2 sm:$0xff] %v219_v8 }
  0x3a   : > { %410 = vrot.lane.b32.xlu0 %v234_v7, %s941_s6  ;;  %299 = vrot.lane.b32.xlu1 %v298_v6, %s942_s7  ;;  %v1084_v9 = vld.sshfl [vmem:[#allocation1] sm:$0xff pattern:$0x75316420]  ;;  %v1086_v10 = vld.sshfl [vmem:[#allocation1 + $0x8] sm:$0xff pattern:$0x75316420] }
  0x3b   : > { %235 = vrot.lane.b32.xlu2 %v234_v7, %s943_s8  ;;  %264 = vst [vmem:[#allocation1] ss:$2 sm:$0xff] %v219_v8 }
  0x42   : > { %v1088_v11 = vld.sshfl [vmem:[#allocation1] sm:$0xff pattern:$0x75316420]  ;;  %v1090_v12 = vld.sshfl [vmem:[#allocation1 + $0x8] sm:$0xff pattern:$0x75316420] }
  0x43   : > { %285 = vst [vmem:[#allocation1] ss:$2 sm:$0xff] %v219_v8 }
  0x4a   : > { %v1092_v13 = vld.sshfl [vmem:[#allocation1] sm:$0xff pattern:$0x75316420]  ;;  %v1094_v14 = vld.sshfl [vmem:[#allocation1 + $0x8] sm:$0xff pattern:$0x75316420] }
  0x4b   : > { %327 = vst [vmem:[#allocation1] ss:$2 sm:$0xff] %v219_v8  ;;  %v290_v35 = vpack.c.bf16 %v1094_v14, %v1092_v13 }
  0x52   : > { %v328_v15 = vld.sshfl [vmem:[#allocation1] sm:$0xff pattern:$0x75316420]  ;;  %v329_v16 = vld.sshfl [vmem:[#allocation1 + $0x8] sm:$0xff pattern:$0x75316420] }
  0x53   : > { %361 = vst [vmem:[#allocation1] ss:$2 sm:$0xff] %v219_v8  ;;  %v332_v34 = vpack.c.bf16 %v329_v16, %v328_v15 }
  0x5a   : > { %v1096_v17 = vld.sshfl [vmem:[#allocation1] sm:$0xff pattern:$0x75316420]  ;;  %v1098_v18 = vld.sshfl [vmem:[#allocation1 + $0x8] sm:$0xff pattern:$0x75316420] }
  0x5b   : > { %371 = vst [vmem:[#allocation1] ss:$2 sm:$0xff] %v219_v8  ;;  %v366_v14 = vpack.c.bf16 %v1098_v18, %v1096_v17  ;;  %v497_v18 = vld [vmem:[%s1214_s2] sm:$0xff] }
  0x5d   : > { %367 = vst [vmem:[#allocation2 + $0x20] sm:$0x33] %v366_v14 }
  0x62   : > { %v1100_v19 = vld.sshfl [vmem:[#allocation1] sm:$0xff pattern:$0x75316420]  ;;  %v1102_v20 = vld.sshfl [vmem:[#allocation1 + $0x8] sm:$0xff pattern:$0x75316420] }
  0x63   : > { %404 = vst [vmem:[#allocation1] ss:$2 sm:$0xff] %v219_v8  ;;  %v376_v27 = vpack.c.bf16 %v1102_v20, %v1100_v19  ;;  %v269_v19 = vpack.c.bf16 %v1090_v12, %v1088_v11 }
  0x6a   : > { %v1104_v21 = vld.sshfl [vmem:[#allocation1] sm:$0xff pattern:$0x75316420]  ;;  %v1106_v22 = vld.sshfl [vmem:[#allocation1 + $0x8] sm:$0xff pattern:$0x75316420] }
  0x6b   : > { %436 = vst [vmem:[#allocation1] ss:$2 sm:$0xff] %v219_v8  ;;  %v409_v62 = vpack.c.bf16 %v1106_v22, %v1104_v21 }
  0x72   : > { %v437_v23 = vld.sshfl [vmem:[#allocation1] sm:$0xff pattern:$0x75316420]  ;;  %v438_v24 = vld.sshfl [vmem:[#allocation1 + $0x8] sm:$0xff pattern:$0x75316420] }
  0x73   : > { %457 = vst [vmem:[#allocation1] ss:$2 sm:$0xff] %v219_v8  ;;  %v441_v25 = vpack.c.bf16 %v438_v24, %v437_v23  ;;  %v226_v8 = vpack.c.bf16 %v1086_v10, %v1084_v9 }
  0x75   : > { %443 = vrot.lane.b32.xlu2 %v441_v25, %s944_s9 }
  0x7a   : > { %v458_v39 = vld.sshfl [vmem:[#allocation1] sm:$0xff pattern:$0x75316420]  ;;  %v459_v42 = vld.sshfl [vmem:[#allocation1 + $0x8] sm:$0xff pattern:$0x75316420] }
  0x7b   : > { %v462_v48 = vpack.c.bf16 %v459_v42, %v458_v39 }
  0x8d   : > { %v334_v26 = vpop.permute.xlu2 %333 }
  0x8e   : > { %v335_v28 = vrot.slane %v334_v26, 4 }
  0x90   : > { %v337_v29 = vsel %vm336_vm6, %v334_v26, %v335_v28 }
  0x91   : > { %v338_v32 = vunpack.c.l.b16 %v337_v29  ;;  %v339_v33 = vunpack.c.h.b16 %v337_v29 }
  0x93   : > { %vm342_vm7 = vcmp.ne.s32.totalorder %v338_v32, %v242_v30  ;;  %vm343_vm8 = vcmp.ne.s32.totalorder %v339_v33, %v243_v31 }
  0x94   : > { %vm344_vm9 = vmpackc.low %vm343_vm8, %vm342_vm7 }
  0x95   : > { %v345_v36 = vsel %vm344_vm9, %v332_v34, 0  ;;  %v236_v43 = vpop.permute.xlu2 %235 }
  0x96   : > { %347 = vrot.lane.b32.xlu2 %v345_v36, %s939_s4  ;;  %v237_v49 = vrot.slane %v236_v43, 4  ;;  %s643_s4 = sshll.u32 %s639_s30, 4  ;;  %s644_s4 = int_to_ptr.hbm [resolvable:$true] %s643_s4 }
  0x98   : > { %v239_v57 = vsel %vm238_vm12, %v236_v43, %v237_v49  ;;  %v741_v49 = vld [vmem:[#allocation2 + $0x20] sm:$0xf] }
  0x99   : > { %v240_v2 = vunpack.c.l.b16 %v239_v57  ;;  %v241_v3 = vunpack.c.h.b16 %v239_v57 }
  0x9b   : > { %vm244_vm9 = vcmp.ne.s32.totalorder %v240_v2, %v242_v30 }
  0x9e   : > { %500 = vperm.xlu2 %829, %v497_v18  }
  0xa4   : > { %v464_v37 = vpop.permute.xlu0 %463  ;;  %v378_v38 = vpop.permute.xlu1 %377 }
  0xa5   : > { %v465_v40 = vrot.slane %v464_v37, 4  ;;  %v379_v41 = vrot.slane %v378_v38, 4 }
  0xa7   : > { %v466_v44 = vsel %vm1216_vm10, %v465_v40, %v464_v37  ;;  %v380_v45 = vsel %vm350_vm11, %v379_v41, %v378_v38 }
  0xa8   : > { %v467_v46 = vunpack.c.l.b16 %v466_v44  ;;  %v468_v47 = vunpack.c.h.b16 %v466_v44  ;;  %v381_v50 = vunpack.c.l.b16 %v380_v45  ;;  %v382_v51 = vunpack.c.h.b16 %v380_v45 }
  0xaa   : > { %vm471_vm13 = vcmp.ne.s32.totalorder %v467_v46, %v242_v30  ;;  %vm472_vm14 = vcmp.ne.s32.totalorder %v468_v47, %v243_v31  ;;  %vm1120_vm2 = vcmp.ne.s32.totalorder %v381_v50, %v242_v30  ;;  %vm1124_vm3 = vcmp.ne.s32.totalorder %v382_v51, %v243_v31  ;;  %v769_v47 = vld [vmem:[#allocation2 + $0x24] sm:$0xf] }
  0xab   : > { %vm473_vm15 = vmpackc.low %vm472_vm14, %vm471_vm13  ;;  %vm245_vm13 = vcmp.ne.s32.totalorder %v241_v3, %v243_v31 }
  0xac   : > { %v411_v52 = vpop.permute.xlu0 %410  ;;  %v474_v53 = vsel %vm473_vm15, %v462_v48, 0  ;;  %v300_v54 = vpop.permute.xlu1 %299  ;;  %vm387_vm4 = vmpackc.low %vm1124_vm3, %vm1120_vm2  ;;  %vm449_vm3 = vcmask 914436  }
  0xad   : > { %v412_v55 = vrot.slane %v411_v52, 4  ;;  %476 = vrot.lane.b32.xlu0 %v474_v53, %s943_s8  ;;  %v301_v56 = vrot.slane %v300_v54, 4  ;;  %v388_v7 = vsel %vm387_vm4, %v376_v27, 0  ;;  %vm246_vm10 = vmpackc.low %vm245_vm13, %vm244_vm9  ;;  %vm395_vm4 = vcmask 1041408  }
  0xae   : > { %v247_v15 = vsel %vm246_vm10, %v226_v8, 0  ;;  %vm452_vm10 = vcmask 1042304   ;;  %vm353_vm9 = vcmask 1041416  }
  0xaf   : > { %v413_v60 = vsel %vm316_vm0, %v412_v55, %v411_v52  ;;  %v303_v61 = vsel %vm302_vm1, %v300_v54, %v301_v56 }
  0xb0   : > { %v414_v63 = vunpack.c.l.b16 %v413_v60  ;;  %v415_v0 = vunpack.c.h.b16 %v413_v60  ;;  %v304_v4 = vunpack.c.l.b16 %v303_v61  ;;  %v305_v5 = vunpack.c.h.b16 %v303_v61 }
  0xb2   : > { %vm418_vm5 = vcmp.ne.s32.totalorder %v414_v63, %v242_v30  ;;  %vm419_vm7 = vcmp.ne.s32.totalorder %v415_v0, %v243_v31  ;;  %vm308_vm14 = vcmp.ne.s32.totalorder %v304_v4, %v242_v30  ;;  %vm309_vm15 = vcmp.ne.s32.totalorder %v305_v5, %v243_v31 }
  0xb3   : > { %vm420_vm8 = vmpackc.low %vm419_vm7, %vm418_vm5  ;;  %vm446_vm5 = vcmask 916480  }
  0xb4   : > { %v421_v6 = vsel %vm420_vm8, %v409_v62, 0  ;;  %vm310_vm2 = vmpackc.low %vm309_vm15, %vm308_vm14  ;;  %vm256_vm8 = vcmask 1045508   ;;  %vm356_vm14 = vcmask 1024   ;;  %vm481_vm15 = vcmask 906244  }
  0xb5   : > { %423 = vrot.lane.b32.xlu1 %v421_v6, %s942_s7  ;;  %390 = vrot.lane.b32.xlu0 %v388_v7, %s940_s5  ;;  %v311_v16 = vsel %vm310_vm2, %v290_v35, 0  ;;  %vm450_vm7 = vmor %vm449_vm3, %vm395_vm4  ;;  %vm484_vm3 = vcmask 1042296   ;;  %v487_v6 = vld [vmem:[%s1213_s1] sm:$0xf]  ;;  %s628_s5 = scalar_lea.sflag [#allocation5], %s1052_s26 }
  0xb6   : > { %vm354_vm13 = vmor %vm256_vm8, %vm353_vm9  ;;  %vm399_vm9 = vcmask 1042424  }
  0xb7   : > { %vm482_vm2 = vmor %vm481_vm15, %vm395_vm4 }
  0xbd   : > { %313 = vrot.lane.b32.xlu1 %v311_v16, %s941_s6  ;;  %249 = vrot.lane.b32.xlu0 %v247_v15, %s938_s23  ;;  %s641_s23 = sshll.u32 %s188_s16, 4  ;;  %s883_s6 = sshra.s32 %s644_s4, 4  ;;  %s642_s23 = int_to_ptr.vmem [resolvable:$true] %s641_s23  ;;  %s884_s6 = int_to_ptr.hbm [resolvable:$true] %s883_s6 }
  0xbe   : > { %s885_s7 = scalar_lea.hbm %s884_s6, 8  ;;  %p890_p0 = scmp.lt.s32.totalorder %s884_s6, %s1215_s3 }
  0xbf   : > { %p886_p6 = scmp.ne.s32.totalorder %s884_s6, %s885_s7 }
  0xc1   : > { %p887_p9 = pnand %p886_p6, %p1016_p11 }
  0xc3   : > { %p888_p13 = pneg %p887_p9 }
  0xc5   : > { %271 = vrot.lane.b32.xlu1 %v269_v19, %s945_s10  ;;  %s889_s10 = scalar_lea.hbm %s1215_s3, 16 }
  0xc6   : > { %p891_p1 = scmp.lt.s32.totalorder %s889_s10, %s885_s7 }
  0xc8   : > { %p892_p3 = por %p891_p1, %p890_p0 }
  0xca   : > { %p893_p4 = pnand %p892_p3, %p888_p13 }
  0xcf   : > { %v444_v9 = vpop.permute.xlu2 %443 }
  0xd0   : > { %v445_v10 = vrot.slane %v444_v9, 4 }
  0xd2   : > { %v447_v20 = vsel %vm446_vm5, %v444_v9, %v445_v10  ;;  %vm428_vm5 = vcmask 922628  }
  0xd3   : > { %451 = vst.msk [vmem:[#allocation2 + $0x38] sm:$0x33] %vm450_vm7, %v447_v20  ;;  %vm429_vm7 = vmor %vm428_vm5, %vm395_vm4  ;;  %vm277_vm5 = vcmask 1041536  }
  0xd4   : > { %453 = vst.msk [vmem:[#allocation2 + $0x3c] sm:$0x3] %vm452_vm10, %v937_v1  ;;  %vm431_vm10 = vcmask 1042312  }
  0xda   : > { %v772_v40 = vld [vmem:[#allocation2 + $0x34] sm:$0xf0] }
  0xdb   : > { %v751_v41 = vld [vmem:[#allocation2 + $0x38] sm:$0xf0] }
  0xf0   : > { %v348_v13 = vpop.permute.xlu2 %347 }
  0xf1   : > { %v349_v11 = vrot.slane %v348_v13, 4 }
  0xf3   : > { %v351_v12 = vsel %vm350_vm11, %v349_v11, %v348_v13  ;;  %vm396_vm11 = vcmask 1037316  }
  0xf4   : > { %355 = vst.msk [vmem:[#allocation2 + $0x18] sm:$0x33] %vm354_vm13, %v351_v12  ;;  %vm319_vm13 = vcmask 1041528  }
  0xf5   : > { %357 = vst.msk [vmem:[#allocation2 + $0x18] sm:$0x3] %vm356_vm14, %v937_v1  ;;  %vm552_vm14 = vcmask 1043456  }
  0xf8   : > { %v501_v7 = vpop.permute.xlu2 %500 }
  0xfb   : > { %v735_v59 = vld [vmem:[#allocation2 + $0x18] sm:$0xf0] }
  0xfc   : > { %v768_v56 = vld [vmem:[#allocation2 + $0x14] sm:$0xf0] }
 0x11f   : > { %v477_v21 = vpop.permute.xlu0 %476 }
 0x120   : > { %v478_v22 = vrot.slane %v477_v21, 4 }
 0x122   : > { %v479_v23 = vsel %vm238_vm12, %v477_v21, %v478_v22  ;;  %vm397_vm12 = vmor %vm396_vm11, %vm395_vm4  ;;  %vm322_vm4 = vcmask 115712  }
 0x123   : > { %483 = vst.msk [vmem:[#allocation2 + $0x40] sm:$0x33] %vm482_vm2, %v479_v23  ;;  %vm259_vm2 = vcmask 132096   ;;  %vm278_vm11 = vmor %vm256_vm8, %vm277_vm5 }
 0x124   : > { %485 = vst.msk [vmem:[#allocation2 + $0x44] sm:$0x3] %vm484_vm3, %v937_v1  ;;  %vm1226_vm3 = vcmask 138240  }
 0x127   : > { %v424_v24 = vpop.permute.xlu1 %423  ;;  %v391_v25 = vpop.permute.xlu0 %390 }
 0x128   : > { %v425_v26 = vrot.slane %v424_v24, 4  ;;  %v392_v17 = vrot.slane %v391_v25, 4 }
 0x12a   : > { %v426_v27 = vsel %vm302_vm1, %v424_v24, %v425_v26  ;;  %v393_v28 = vsel %vm336_vm6, %v391_v25, %v392_v17  ;;  %vm255_vm1 = vcmask 1041544   ;;  %vm320_vm6 = vmor %vm256_vm8, %vm319_vm13 }
 0x12b   : > { %430 = vst.msk [vmem:[#allocation2 + $0x30] sm:$0x33] %vm429_vm7, %v426_v27  ;;  %v496_v29 = vld [vmem:[#allocation2 + $0x40] sm:$0xff]  ;;  %vm257_vm15 = vmor %vm256_vm8, %vm255_vm1  ;;  %vm280_vm7 = vcmask 123904   ;;  %vm548_vm8 = vcmask 588800  }
 0x12c   : > { %432 = vst.msk [vmem:[#allocation2 + $0x34] sm:$0x3] %vm431_vm10, %v937_v1  ;;  %v528_v30 = vunpack.c.l.b16 %v496_v29  ;;  %v529_v31 = vunpack.c.h.b16 %v496_v29 }
 0x12d   : > { %398 = vst.msk [vmem:[#allocation2 + $0x28] sm:$0x33] %vm397_vm12, %v393_v28 }
 0x12e   : > { %400 = vst.msk [vmem:[#allocation2 + $0x2c] sm:$0x3] %vm399_vm9, %v937_v1  ;;  %v538_v32 = vpack.c.b16 %v528_v30, %v528_v30  ;;  %v539_v33 = vpack.c.b16 %v529_v31, %v529_v31 }
 0x12f   : > { %v314_v34 = vpop.permute.xlu1 %313  ;;  %v250_v35 = vpop.permute.xlu0 %249 }
 0x130   : > { %v315_v36 = vrot.slane %v314_v34, 4  ;;  %v554_v37 = vsel %vm552_vm14, %v538_v32, 0  ;;  %v557_v38 = vsel %vm552_vm14, %v539_v33, 0  ;;  %v251_v39 = vrot.slane %v250_v35, 4 }
 0x131   : > { %562 = vmatpush.bf16.msra.mxu0 %v554_v37  ;;  %575 = vmatpush.bf16.msra.mxu1 %v557_v38 }
 0x132   : > { %v317_v42 = vsel %vm316_vm0, %v315_v36, %v314_v34  ;;  %v253_v43 = vsel %vm1226_vm3, %v251_v39, %v250_v35  ;;  %v749_v44 = vld [vmem:[#allocation2 + $0x30] sm:$0xf]  ;;  %vm274_vm0 = vcmask 130048  }
 0x133   : > { %321 = vst.msk [vmem:[#allocation2 + $0x10] sm:$0x33] %vm320_vm6, %v317_v42  ;;  %v750_v45 = vor.u32 %v772_v40, %v749_v44  ;;  %v771_v46 = vld [vmem:[#allocation2 + $0x34] sm:$0xf] }
 0x134   : > { %323 = vst.msk [vmem:[#allocation2 + $0x10] sm:$0x3] %vm322_vm4, %v937_v1  ;;  %v754_v48 = vor.u32 %v771_v46, %v751_v41  ;;  %v770_v50 = vld [vmem:[#allocation2 + $0x24] sm:$0xf0] }
 0x135   : > { %258 = vst.msk [vmem:[#allocation2] sm:$0x33] %vm257_vm15, %v253_v43  ;;  %563 = vmatpush.bf16.msra.mxu0 %v750_v45  ;;  %v743_v51 = vld [vmem:[#allocation2 + $0x28] sm:$0xf0]  ;;  %v742_v54 = vor.u32 %v770_v50, %v741_v49 }
 0x136   : > { %260 = vst.msk [vmem:[#allocation2] sm:$0x3] %vm259_vm2, %v937_v1  ;;  %576 = vmatpush.bf16.msra.mxu1 %v754_v48  ;;  %v746_v52 = vor.u32 %v769_v47, %v743_v51 }
 0x137   : > { %v272_v53 = vpop.permute.xlu1 %271 }
 0x138   : > { %v273_v55 = vrot.slane %v272_v53, 4 }
 0x139   : > { %564 = vmatpush.bf16.msra.mxu0 %v742_v54 }
 0x13a   : > { %v275_v57 = vsel %vm274_vm0, %v273_v55, %v272_v53  ;;  %577 = vmatpush.bf16.msra.mxu1 %v746_v52  ;;  %v767_v58 = vld [vmem:[#allocation2 + $0x14] sm:$0xf] }
 0x13b   : > { %279 = vst.msk [vmem:[#allocation2 + $0x8] sm:$0x33] %vm278_vm11, %v275_v57  ;;  %v738_v60 = vor.u32 %v767_v58, %v735_v59  ;;  %v733_v61 = vld [vmem:[#allocation2 + $0x10] sm:$0xf] }
 0x13c   : > { %281 = vst.msk [vmem:[#allocation2 + $0x8] sm:$0x3] %vm280_vm7, %v937_v1  ;;  %v734_v62 = vor.u32 %v768_v56, %v733_v61  ;;  %v765_v0 = vld [vmem:[#allocation2 + $0x4] sm:$0xf] }
 0x13d   : > { %v725_v63 = vld [vmem:[#allocation2] sm:$0xf] }
 0x13e   : > { %578 = vmatpush.bf16.msra.mxu1 %v738_v60  ;;  %565 = vmatpush.bf16.msra.mxu0 %v734_v62 }
 0x142   : > { %v727_v2 = vld [vmem:[#allocation2 + $0x8] sm:$0xf0] }
 0x143   : > { %v730_v3 = vor.u32 %v765_v0, %v727_v2  ;;  %v766_v4 = vld [vmem:[#allocation2 + $0x4] sm:$0xf0] }
 0x144   : > { %v726_v5 = vor.u32 %v766_v4, %v725_v63 }
 0x145   : > { %579 = vmatpush.bf16.msra.mxu1 %v730_v3 }
 0x146   : > { %566 = vmatpush.bf16.msra.mxu0 %v726_v5 }
 0x148   : > { %756 = vmatmul.msk.bf16.vlgmr.msra.gmra.mxu1 %vm548_vm8, %v487_v6 }
 0x149   : > { %755 = vmatmul.msk.bf16.vlgmr.msra.gmra.mxu0 %vm548_vm8, %v487_v6 }
 0x1c5   : > { %v581_v1 = vpop.f32.mrf.mxu1 }
 0x1c6   : > { %v582_v8 = vadd.f32 %v581_v1, %v501_v7  ;;  %v568_v15 = vpop.f32.mrf.mxu0 }
 0x1c7   : > { %v569_v16 = vadd.f32 %v568_v15, %v501_v7 }
 0x1c8   : > { %v758_v19 = vmul.f32 -1.442695, %v582_v8 }
 0x1c9   : > { %v757_v9 = vmul.f32 -1.442695, %v569_v16 }
 0x1ca   : > { %831 = vpow2.f32 %v758_v19 }
 0x1cb   : > { %833 = vpow2.f32 %v757_v9 }
 0x1cd   : > { %v583_v10 = vpop.f32.mrf.mxu1 }
 0x1ce   : > { %v570_v20 = vpop.f32.mrf.mxu0 }
 0x1d0   : > { %v832_v13 = vpop.eup %831 }
 0x1d1   : > { %v834_v11 = vpop.eup %833  ;;  %v592_v12 = vadd.f32 1.0, %v832_v13 }
 0x1d2   : > { %v591_v14 = vadd.f32 1.0, %v834_v11 }
 0x1d3   : > { %835 = vrcp.f32 %v592_v12  ;;  %v619_v26 = vand.u32 2147483648, %v592_v12  ;;  %v617_v27 = vand.u32 2147483647, %v592_v12  ;;  %vm613_vm9 = vweird.f32 %v592_v12 }
 0x1d4   : > { %837 = vrcp.f32 %v591_v14  ;;  %v604_v28 = vand.u32 2147483648, %v591_v14  ;;  %v602_v30 = vand.u32 2147483647, %v591_v14  ;;  %vm598_vm14 = vweird.f32 %v591_v14 }
 0x1d5   : > { %v620_v32 = vor.u32 1.1754944e-38, %v619_v26  ;;  %vm618_vm1 = vcmp.eq.f32.partialorder %v617_v27, 8.507059e+37 }
 0x1d6   : > { %v605_v35 = vor.u32 1.1754944e-38, %v604_v28  ;;  %vm603_vm4 = vcmp.eq.f32.partialorder %v602_v30, 8.507059e+37 }
 0x1d9   : > { %v836_v21 = vpop.eup %835 }
 0x1da   : > { %v838_v22 = vpop.eup %837  ;;  %v609_v23 = vmul.f32 %v836_v21, %v592_v12  ;;  %vm614_vm10 = vweird.f32 %v836_v21 }
 0x1db   : > { %v594_v24 = vmul.f32 %v838_v22, %v591_v14  ;;  %vm599_vm12 = vweird.f32 %v838_v22  ;;  %vm615_vm13 = vmor %vm613_vm9, %vm614_vm10 }
 0x1dc   : > { %v610_v25 = vsub.f32 1.0, %v609_v23  ;;  %vm600_vm6 = vmor %vm598_vm14, %vm599_vm12 }
 0x1dd   : > { %v595_v17 = vsub.f32 1.0, %v594_v24 }
 0x1de   : > { %v611_v18 = vmul.f32 %v836_v21, %v610_v25 }
 0x1df   : > { %v596_v29 = vmul.f32 %v838_v22, %v595_v17 }
 0x1e0   : > { %v612_v31 = vadd.f32 %v836_v21, %v611_v18 }
 0x1e1   : > { %v597_v33 = vadd.f32 %v838_v22, %v596_v29 }
 0x1e2   : > { %v616_v34 = vsel %vm615_vm13, %v836_v21, %v612_v31 }
 0x1e3   : > { %v621_v36 = vsel %vm618_vm1, %v620_v32, %v616_v34  ;;  %v601_v37 = vsel %vm600_vm6, %v838_v22, %v597_v33 }
 0x1e4   : > { %v624_v38 = vmul.f32 %v621_v36, %v582_v8  ;;  %v606_v39 = vsel %vm603_vm4, %v605_v35, %v601_v37 }
 0x1e5   : > { %v623_v40 = vmul.f32 %v606_v39, %v569_v16 }
 0x1e7   : > { %v625_v41 = vpack.c.bf16 %v624_v38, %v623_v40 }
 0x1e9   : > { %626 = vst [vmem:[%s188_s16] sm:$0xff] %v625_v41 }
 0x1ea   : > { %896 = shalt.err (!%p893_p4)
}
 0x1eb   : > { %776 = dma.vmem_to_hbm [thread:$0]  (%p1016_p11), %s642_s23, 128, %s644_s4, %s628_s5  }
 0x1ec PF: > { %s655_s26 = sand.u32 1, %s923_s12   ;;  %p1227_p7 = scmp.ge.s32.totalorder %s935_s15, 2 }
 0x1ed   : > { %s656_s17 = scalar_lea.sflag [#allocation5], %s655_s26 }
 0x1ee   : > { %p783_p5 = pnand %p1227_p7, %p1020_p12 }
 0x1f0   : > { %p784_p8 = pneg %p783_p5 }
 0x1f2   : > { %918 = dma.done.wait (%p784_p8), %s656_s17, 128  }
 0x1f3   : > { %920 = vsyncadd (%p784_p8), %s656_s17, 4294967168  ;;  %p16_p10 = scmp.ge.s32.totalorder %s991_s18, 4   ;;  %s1228_s12 = smov %s927_s13 }
 0x1f4   : > { %s1229_s13 = smov %s931_s14  ;;  %s1230_s14 = smov %s1003_s21 }
 0x1f5   : > { %s1231_s15 = smov %s991_s18  ;;  %18 = sbr.rel (!%p16_p10) target bundleno = 5 (0x5), region = 77 }
 0x1fa   :  { %662 = vsyncpa [#allocation4], 1 }
 0x1fb   :  { %664 = vsyncpa [#allocation4 + $0x1], 1 }
 0x1fc   :  { %665 = vsyncpa [#allocation5], 1 }
 0x1fd   :  { %667 = vsyncpa [#allocation5 + $0x1], 1 }

</bundles_post_ra>
